<compile_context>
chip_gen: v6e
topology: v6e:2x2x1
jax: 0.10.0
libtpu: 0.0.40
codegen_flags: <defaults>
</compile_context>

<pallas_src>
import jax
import jax.numpy as jnp
from jax.experimental import pallas as pl
from jax.experimental.pallas import tpu as pltpu


def _mlp_kernel(x_ref, w1_ref, b1_ref, w2_ref, b2_ref, o_ref):
    # Cast x to the matmul dtype *inside* the kernel (no-op on the f32 path).
    x = x_ref[...].astype(w1_ref.dtype)
    # Layer 1: MXU matmul with f32 accumulation; bias-add + ReLU in f32 on the VPU.
    h = jnp.dot(x, w1_ref[...], preferred_element_type=jnp.float32)
    h = jnp.maximum(h + b1_ref[...], 0.0)
    # Layer 2: activations in the matmul dtype for the MXU, accumulate in f32,
    # bias-add in f32, store in the output dtype.
    y = jnp.dot(h.astype(w2_ref.dtype), w2_ref[...],
                preferred_element_type=jnp.float32)
    o_ref[...] = (y + b2_ref[...]).astype(o_ref.dtype)


def _round_up(x, m):
    return ((x + m - 1) // m) * m


def prepare_params(w1, b1, w2, b2, matmul_dtype=jnp.float32):
    """One-time parameter prep (hoisted out of the per-call wrapper).

    Zero-pads hidden_dim to a multiple of 128 (exact: padded w1/b1 columns are 0,
    relu(0)=0, padded w2 rows contribute 0) and casts weights to matmul_dtype,
    biases to f32.
    """
    hidden_dim = w1.shape[1]
    hidden_pad = max(_round_up(hidden_dim, 128), 128)
    if hidden_pad != hidden_dim:
        w1 = jnp.pad(w1, ((0, 0), (0, hidden_pad - hidden_dim)))
        b1 = jnp.pad(b1, ((0, 0), (0, hidden_pad - hidden_dim)))
        w2 = jnp.pad(w2, ((0, hidden_pad - hidden_dim), (0, 0)))
    return {
        "w1": w1.astype(matmul_dtype),
        "b1": b1.astype(jnp.float32),
        "w2": w2.astype(matmul_dtype),
        "b2": b2.astype(jnp.float32),
    }


def _vmem_limit_bytes(tb, state_dim, hidden_pad, action_dim, x_bytes, mm_bytes):
    # Rough footprint: double-buffered x/out tiles, weights/biases (count x2 to be
    # safe), intermediate activations, 4x headroom, clamped to 32 MiB.
    x_tile = 2 * tb * state_dim * x_bytes
    out_tile = 2 * tb * action_dim * 4
    weights = 2 * (state_dim * hidden_pad + hidden_pad * action_dim) * mm_bytes
    biases = 2 * (hidden_pad + action_dim) * 4
    h_act = tb * hidden_pad * 4
    est = x_tile + out_tile + weights + biases + h_act
    return int(min(32 * 1024 * 1024, max(4 * 1024 * 1024, 4 * est)))


def value_net_discrete_forward(x, params, *, block_batch=4096):
    """Fused MLP forward: relu(x @ w1 + b1) @ w2 + b2.

    x:       [B, state_dim] (any float dtype; cast to matmul dtype inside the kernel)
    params:  dict from prepare_params() with padded/cast w1, b1, w2, b2
    returns  [B, action_dim] in x.dtype.
    """
    w1, b1, w2, b2 = params["w1"], params["b1"], params["w2"], params["b2"]
    batch, state_dim = x.shape
    hidden_pad = w1.shape[1]
    action_dim = w2.shape[1]
    out_dtype = x.dtype

    # --- Batch tiling: big tiles (mult. of 16 for the bf16 path), partial last
    # block allowed; its out-of-range rows are unspecified and sliced off below. ---
    tb = min(block_batch, _round_up(batch, 16))
    tb = max(_round_up(tb, 16), 16)
    num_steps = pl.cdiv(batch, tb)
    if num_steps > 1 and num_steps % 2 == 1:
        # v7x: even step count balances the 2 TensorCores; harmless on v5e/v6e.
        tb = max(_round_up(-(-batch // (num_steps + 1)), 16), 16)
        num_steps = pl.cdiv(batch, tb)
    grid = (num_steps,)

    vmem_limit = _vmem_limit_bytes(
        tb, state_dim, hidden_pad, action_dim,
        x.dtype.itemsize, w1.dtype.itemsize)

    out = pl.pallas_call(
        _mlp_kernel,
        out_shape=jax.ShapeDtypeStruct((batch, action_dim), out_dtype),
        grid_spec=pltpu.PrefetchScalarGridSpec(
            num_scalar_prefetch=0,
            grid=grid,
            in_specs=[
                # x: tiled over batch, auto double-buffered, original dtype.
                pl.BlockSpec((tb, state_dim), lambda i: (i, 0)),
                # Weights / biases: same block every step -> VMEM-resident.
                pl.BlockSpec((state_dim, hidden_pad), lambda i: (0, 0)),
                pl.BlockSpec((1, hidden_pad), lambda i: (0, 0)),
                pl.BlockSpec((hidden_pad, action_dim), lambda i: (0, 0)),
                pl.BlockSpec((1, action_dim), lambda i: (0, 0)),
            ],
            out_specs=pl.BlockSpec((tb, action_dim), lambda i: (i, 0)),
        ),
        compiler_params=pltpu.CompilerParams(
            dimension_semantics=("parallel",),  # v7x: shard batch over both TCs
            vmem_limit_bytes=vmem_limit,
        ),
    )(x, w1, b1, w2, b2)

    # Rows beyond `batch` in the last partial block were never computed from real
    # data; they are dropped here and must never feed a fused downstream reduction.
    return out[:batch]


def init_params(key, state_dim, hidden_dim, action_dim, dtype=jnp.float32):
    """Mirror PyTorch nn.Linear default init (U[-1/sqrt(fan_in), 1/sqrt(fan_in)])."""
    k1, k2, k3, k4 = jax.random.split(key, 4)
    lim1 = 1.0 / (state_dim ** 0.5)
    lim2 = 1.0 / (hidden_dim ** 0.5)
    w1 = jax.random.uniform(k1, (state_dim, hidden_dim), dtype, -lim1, lim1)
    b1 = jax.random.uniform(k2, (1, hidden_dim), dtype, -lim1, lim1)
    w2 = jax.random.uniform(k3, (hidden_dim, action_dim), dtype, -lim2, lim2)
    b2 = jax.random.uniform(k4, (1, action_dim), dtype, -lim2, lim2)
    return w1, b1, w2, b2


if __name__ == "__main__":
    # Small shapes consistent with the module: state_dim=8, hidden_dim=32, action_dim=4.
    state_dim, hidden_dim, action_dim = 8, 32, 4
    key = jax.random.PRNGKey(0)
    kx, kp, kx2 = jax.random.split(key, 3)
    w1, b1, w2, b2 = init_params(kp, state_dim, hidden_dim, action_dim)

    def ref_fwd(x):
        return jnp.maximum(x @ w1 + b1, 0.0) @ w2 + b2

    # 1) Tiny batch, default (exact f32) matmul path; params prepared once.
    params_f32 = prepare_params(w1, b1, w2, b2, matmul_dtype=jnp.float32)
    x = jax.random.normal(kx, (2, state_dim), jnp.float32)
    out = value_net_discrete_forward(x, params_f32)
    out = jax.block_until_ready(out)
    assert out.shape == (2, action_dim)
    assert jnp.allclose(out, ref_fwd(x), atol=1e-5, rtol=1e-5)

    # 2) Larger batch exercising the grid (non-dividing batch -> partial last block,
    #    odd->even step rebalancing), bf16 MXU path.
    params_bf16 = prepare_params(w1, b1, w2, b2, matmul_dtype=jnp.bfloat16)
    x2 = jax.random.normal(kx2, (600, state_dim), jnp.float32)
    out2 = value_net_discrete_forward(x2, params_bf16, block_batch=256)
    out2 = jax.block_until_ready(out2)
    assert out2.shape == (600, action_dim)
    assert jnp.allclose(out2, ref_fwd(x2), atol=5e-2, rtol=5e-2)

    print("KERNEL_OK")
</pallas_src>

<mosaic_0001>
module attributes {stable_mosaic.version = 11 : i64} {
  func.func @_mlp_kernel(%arg0: i32, %arg1: memref<16x8xf32, #tpu.memory_space<vmem>>, %arg2: memref<8x128xf32, #tpu.memory_space<vmem>>, %arg3: memref<1x128xf32, #tpu.memory_space<vmem>>, %arg4: memref<128x4xf32, #tpu.memory_space<vmem>>, %arg5: memref<1x4xf32, #tpu.memory_space<vmem>>, %arg6: memref<16x4xf32, #tpu.memory_space<vmem>>) attributes {dimension_semantics = [#tpu.dimension_semantics<parallel>], iteration_bounds = array<i64: 1>, scalar_prefetch = 0 : i64, scratch_operands = 0 : i64, tpu.core_type = #tpu.core_type<tc>, window_params = [{transform_indices = @transform_0, window_bounds = array<i64: 16, 8>}, {pipeline_mode = #tpu.pipeline_mode<synchronous>, transform_indices = @transform_1, window_bounds = array<i64: 8, 128>}, {pipeline_mode = #tpu.pipeline_mode<synchronous>, transform_indices = @transform_2, window_bounds = array<i64: 1, 128>}, {pipeline_mode = #tpu.pipeline_mode<synchronous>, transform_indices = @transform_3, window_bounds = array<i64: 128, 4>}, {pipeline_mode = #tpu.pipeline_mode<synchronous>, transform_indices = @transform_4, window_bounds = array<i64: 1, 4>}, {transform_indices = @transform_5, window_bounds = array<i64: 16, 4>}]} {
    %c0 = arith.constant 0 : index
    %c0_0 = arith.constant 0 : index
    %0 = vector.load %arg1[%c0, %c0_0] : memref<16x8xf32, #tpu.memory_space<vmem>>, vector<16x8xf32>
    %c0_1 = arith.constant 0 : index
    %c0_2 = arith.constant 0 : index
    %1 = vector.load %arg2[%c0_1, %c0_2] : memref<8x128xf32, #tpu.memory_space<vmem>>, vector<8x128xf32>
    %cst = arith.constant dense<0.000000e+00> : vector<16x128xf32>
    %2 = tpu.matmul %0, %1, %cst {dimension_numbers = #tpu.dot_dimension_numbers<[1], [0], [0], [1], [0, 0, 1, 1], [], []>} : vector<16x8xf32>, vector<8x128xf32>, vector<16x128xf32> -> vector<16x128xf32>
    %c0_3 = arith.constant 0 : index
    %c0_4 = arith.constant 0 : index
    %3 = vector.load %arg3[%c0_3, %c0_4] : memref<1x128xf32, #tpu.memory_space<vmem>>, vector<1x128xf32>
    %4 = vector.broadcast %3 : vector<1x128xf32> to vector<16x128xf32>
    %5 = arith.addf %2, %4 : vector<16x128xf32>
    %cst_5 = arith.constant 0.000000e+00 : f32
    %6 = vector.broadcast %cst_5 : f32 to vector<16x128xf32>
    %7 = arith.maximumf %5, %6 : vector<16x128xf32>
    %c0_6 = arith.constant 0 : index
    %c0_7 = arith.constant 0 : index
    %8 = vector.load %arg4[%c0_6, %c0_7] : memref<128x4xf32, #tpu.memory_space<vmem>>, vector<128x4xf32>
    %cst_8 = arith.constant dense<0.000000e+00> : vector<16x4xf32>
    %9 = tpu.matmul %7, %8, %cst_8 {dimension_numbers = #tpu.dot_dimension_numbers<[1], [0], [0], [1], [0, 0, 1, 1], [], []>} : vector<16x128xf32>, vector<128x4xf32>, vector<16x4xf32> -> vector<16x4xf32>
    %c0_9 = arith.constant 0 : index
    %c0_10 = arith.constant 0 : index
    %10 = vector.load %arg5[%c0_9, %c0_10] : memref<1x4xf32, #tpu.memory_space<vmem>>, vector<1x4xf32>
    %11 = vector.broadcast %10 : vector<1x4xf32> to vector<16x4xf32>
    %12 = arith.addf %9, %11 : vector<16x4xf32>
    %c0_11 = arith.constant 0 : index
    %c0_12 = arith.constant 0 : index
    %13 = vector.load %arg6[%c0_11, %c0_12] : memref<16x4xf32, #tpu.memory_space<vmem>>, vector<16x4xf32>
    tpu.vector_store %arg6[%c0_11, %c0_12], %12 {strides = array<i32>} : memref<16x4xf32, #tpu.memory_space<vmem>>, vector<16x4xf32>,
    return
  }
  func.func @transform_0(%arg0: i32) -> (i32, i32) {
    %c0_i32 = arith.constant 0 : i32
    %c0_i32_0 = arith.constant 0 : i32
    return %arg0, %c0_i32 : i32, i32
  }
  func.func @transform_1(%arg0: i32) -> (i32, i32) {
    %c0_i32 = arith.constant 0 : i32
    %c0_i32_0 = arith.constant 0 : i32
    %c0_i32_1 = arith.constant 0 : i32
    return %c0_i32, %c0_i32_0 : i32, i32
  }
  func.func @transform_2(%arg0: i32) -> (i32, i32) {
    %c0_i32 = arith.constant 0 : i32
    %c0_i32_0 = arith.constant 0 : i32
    %c0_i32_1 = arith.constant 0 : i32
    return %c0_i32, %c0_i32_0 : i32, i32
  }
  func.func @transform_3(%arg0: i32) -> (i32, i32) {
    %c0_i32 = arith.constant 0 : i32
    %c0_i32_0 = arith.constant 0 : i32
    %c0_i32_1 = arith.constant 0 : i32
    return %c0_i32, %c0_i32_0 : i32, i32
  }
  func.func @transform_4(%arg0: i32) -> (i32, i32) {
    %c0_i32 = arith.constant 0 : i32
    %c0_i32_0 = arith.constant 0 : i32
    %c0_i32_1 = arith.constant 0 : i32
    return %c0_i32, %c0_i32_0 : i32, i32
  }
  func.func @transform_5(%arg0: i32) -> (i32, i32) {
    %c0_i32 = arith.constant 0 : i32
    %c0_i32_0 = arith.constant 0 : i32
    return %arg0, %c0_i32 : i32, i32
  }
}

</mosaic_0001>

<bundles_post_ra>
// kernel: tpu_custom_call.1
= control target key start
LH: loop header
LB: loop body
LE: loop exit
PB: predicated region body
PF: predicated region fallthrough
CT: control target
= control target key end

     0   :  { %10 = vsyncpa [#allocation3], 0  ;;  %vm31_vm0 = vcmask 64512   ;;  %vm213_vm1 = vcmask 31744   ;;  %s421_s0 = inlined_call_operand.vmem [shape: f32[2,8], index: 0, kind: input, shape index: {}]   ;;  %s422_s1 = inlined_call_operand.vmem [shape: f32[8,128], index: 1, kind: input, shape index: {}]   ;;  %s423_s2 = inlined_call_operand.vmem [shape: f32[1,128], index: 2, kind: input, shape index: {}]   ;;  %s424_s3 = inlined_call_operand.vmem [shape: f32[128,4], index: 3, kind: input, shape index: {}]   ;;  %s425_s4 = inlined_call_operand.vmem [shape: f32[1,4], index: 4, kind: input, shape index: {}]   ;;  %s426_s5 = inlined_call_operand.hbm [shape: f32[2,4], index: 5, kind: output, shape index: {}]  }
   0x1   :  { %v23_v0 = vld [vmem:[%s422_s1] sm:$0xff]  ;;  %v22_v2 = vld [vmem:[%s421_s0 + $0x8] sm:$0xff]  ;;  %v130_v3 = vld [vmem:[%s424_s3 + $0x78] sm:$0xff] }
   0x2   :  { %v21_v1 = vld [vmem:[%s421_s0] sm:$0xff]  ;;  %257 = vmatprep.subr.mxu0 %v23_v0  ;;  %v129_v4 = vld [vmem:[%s424_s3 + $0x70] sm:$0xff]  ;;  %262 = vmatprep.subr.mxu1 %v130_v3  ;;  %v128_v5 = vld [vmem:[%s424_s3 + $0x68] sm:$0xff] }
   0x3   :  { %259 = vmatprep.mubr.msk.f32.mxu0 %vm31_vm0, %v21_v1  ;;  %258 = vmatpush3.msra.mxu0 %v23_v0  ;;  %v127_v6 = vld [vmem:[%s424_s3 + $0x60] sm:$0xff]  ;;  %v126_v7 = vld [vmem:[%s424_s3 + $0x58] sm:$0xff]  ;;  %v125_v8 = vld [vmem:[%s424_s3 + $0x50] sm:$0xff] }
   0x4   :  { %260 = vmatmul.mubr.msk.f32.vlgmr.msra.gmra.mxu0 %vm31_vm0, %v22_v2  ;;  %263 = vmatpush3.msra.mxu1 %v130_v3  ;;  %v124_v9 = vld [vmem:[%s424_s3 + $0x48] sm:$0xff]  ;;  %v123_v10 = vld [vmem:[%s424_s3 + $0x40] sm:$0xff]  ;;  %v122_v11 = vld [vmem:[%s424_s3 + $0x38] sm:$0xff] }
   0x5   :  { %264 = vmatprep.subr.mxu1 %v129_v4  ;;  %v121_v12 = vld [vmem:[%s424_s3 + $0x30] sm:$0xff]  ;;  %v120_v13 = vld [vmem:[%s424_s3 + $0x28] sm:$0xff]  ;;  %v119_v14 = vld [vmem:[%s424_s3 + $0x20] sm:$0xff] }
   0x6   :  { %265 = vmatpush3.msra.mxu1 %v129_v4  ;;  %v118_v15 = vld [vmem:[%s424_s3 + $0x18] sm:$0xff]  ;;  %v117_v16 = vld [vmem:[%s424_s3 + $0x10] sm:$0xff]  ;;  %v116_v17 = vld [vmem:[%s424_s3 + $0x8] sm:$0xff] }
   0x7   :  { %266 = vmatprep.subr.mxu1 %v128_v5  ;;  %v115_v18 = vld [vmem:[%s424_s3] sm:$0xff] }
   0x8   :  { %267 = vmatpush3.msra.mxu1 %v128_v5  ;;  %v232_v19 = vld [vmem:[%s423_s2] ss:$0 sm:$0xff] }
   0x9   :  { %268 = vmatprep.subr.mxu1 %v127_v6  ;;  %v235_v26 = vld [vmem:[%s425_s4] ss:$0 sm:$0xff] }
   0xa   :  { %269 = vmatpush3.msra.mxu1 %v127_v6 }
   0xb   :  { %270 = vmatprep.subr.mxu1 %v126_v7 }
   0xc   :  { %271 = vmatpush3.msra.mxu1 %v126_v7 }
   0xd   :  { %272 = vmatprep.subr.mxu1 %v125_v8 }
   0xe   :  { %273 = vmatpush3.msra.mxu1 %v125_v8 }
   0xf   :  { %274 = vmatprep.subr.mxu1 %v124_v9 }
  0x10   :  { %275 = vmatpush3.msra.mxu1 %v124_v9 }
  0x11   :  { %276 = vmatprep.subr.mxu1 %v123_v10 }
  0x12   :  { %277 = vmatpush3.msra.mxu1 %v123_v10 }
  0x13   :  { %278 = vmatprep.subr.mxu1 %v122_v11 }
  0x14   :  { %279 = vmatpush3.msra.mxu1 %v122_v11 }
  0x15   :  { %280 = vmatprep.subr.mxu1 %v121_v12 }
  0x16   :  { %281 = vmatpush3.msra.mxu1 %v121_v12 }
  0x17   :  { %282 = vmatprep.subr.mxu1 %v120_v13 }
  0x18   :  { %283 = vmatpush3.msra.mxu1 %v120_v13 }
  0x19   :  { %284 = vmatprep.subr.mxu1 %v119_v14 }
  0x1a   :  { %285 = vmatpush3.msra.mxu1 %v119_v14 }
  0x1b   :  { %286 = vmatprep.subr.mxu1 %v118_v15 }
  0x1c   :  { %287 = vmatpush3.msra.mxu1 %v118_v15 }
  0x1d   :  { %288 = vmatprep.subr.mxu1 %v117_v16 }
  0x1e   :  { %289 = vmatpush3.msra.mxu1 %v117_v16 }
  0x1f   :  { %290 = vmatprep.subr.mxu1 %v116_v17 }
  0x20   :  { %291 = vmatpush3.msra.mxu1 %v116_v17 }
  0x21   :  { %292 = vmatprep.subr.mxu1 %v115_v18 }
  0x22   :  { %293 = vmatpush3.msra.mxu1 %v115_v18 }
  0xc4   :  { %v261_v20 = vpop.f32.mrf.mxu0 }
  0xc5   :  { %v110_v21 = vadd.f32 %v261_v20, %v232_v19 }
  0xc6   :  { %v104_v22 = vpop.f32.mrf.mxu0 }
  0xc7   :  { %v105_v23 = vadd.f32 %v232_v19, %v104_v22  ;;  %v114_v25 = vmax.f32 %v110_v21, 0.0 }
  0xc9   :  { %v113_v24 = vmax.f32 %v105_v23, 0.0 }
  0xcb   :  { %294 = vmatprep.mubr.f32.mxu1 %v113_v24 }
  0xcc   :  { %295 = vmatmul.mubr.f32.vlgmr.msra.gmra.mxu1 %v114_v25 }
 0x18c   :  { %v296_v27 = vpop.f32.mrf.mxu1 }
 0x18d   :  { %v210_v28 = vadd.f32 %v296_v27, %v235_v26 }
 0x18e   :  { %v204_v29 = vpop.f32.mrf.mxu1 }
 0x18f   :  { %215 = vst.msk [vmem:[#allocation2 + $0x8] sm:$0xff] %vm213_vm1, %v210_v28  ;;  %v205_v30 = vadd.f32 %v235_v26, %v204_v29 }
 0x191   :  { %214 = vst.msk [vmem:[#allocation2] sm:$0xff] %vm213_vm1, %v205_v30 }
 0x192   :  { %220 = vsyncadd [#allocation3], 224  ;;  %s322_s2 = smov [#allocation2]  }
 0x193   :  { %s221_s3 = sshll.u32 %s322_s2, 4  ;;  %s222_s3 = int_to_ptr.vmem [resolvable:$true] %s221_s3 }
 0x194   :  { %s300_s6 = scalar_lea.vmem %s222_s3, 32  ;;  %s304_s7 = scalar_lea.vmem %s222_s3, 256 }
 0x195   :  { %p301_p0 = scmp.ne.s32.totalorder %s222_s3, %s300_s6  ;;  %p305_p1 = scmp.lt.s32.totalorder %s222_s3, %s222_s3 }
 0x196   :  { %p306_p2 = scmp.lt.s32.totalorder %s304_s7, %s300_s6 }
 0x198   :  { %p307_p3 = por %p306_p2, %p305_p1 }
 0x19a   :  { %p308_p4 = pnand %p307_p3, %p301_p0 }
 0x19c   :  { %311 = shalt.err (!%p308_p4)
}
 0x19d   :  { %s323_s4 = smov 32   ;;  %s324_s8 = smov 2  }
 0x19e   :  { %227 = dma.vmem_to_hbm [thread:$0]  %s222_s3, 32, %s426_s5, [#allocation3], %s323_s4, %s323_s4, %s324_s8  }
 0x19f   :  { %320 = dma.done.wait [#allocation3], 256  }
 0x1a0   :  { %321 = vsyncadd [#allocation3], 4294967040 }
 0x1a1   :  { %231 = vsyncpa [#allocation3], 1 }

</bundles_post_ra>
